<compile_context>
chip_gen: v5e
topology: v5e:2x2
jax: 0.10.0
libtpu: 0.0.40
codegen_flags: <defaults>
</compile_context>

<pallas_src>
import math

import jax
import jax.numpy as jnp
import numpy as np
from jax import lax
from jax.experimental import pallas as pl
from jax.experimental.pallas import tpu as pltpu

_MASK_DTYPE = jnp.bfloat16   # keep / partner-one-hot stream dtype (0/1 exact)


def _round_up(x, m):
    return ((x + m - 1) // m) * m


def _l2_normalize(x, eps2=1e-16):
    # eps2 = (1e-8)^2 mirrors F.cosine_similarity's eps for near-zero rows.
    ss = jnp.sum(x * x, axis=-1, keepdims=True)
    return x * lax.rsqrt(jnp.maximum(ss, eps2))


def _fused_order_stats(E, k_lo, k_hi, n_iter=31):
    """Exact k_lo-th and k_hi-th smallest values per row (last axis) of E >= 0.

    Single integer bisection on the f32 bit pattern (order-preserving for
    non-negative floats): <= 31 iterations, exact, no snap margin.  The k_hi
    order stat (k_hi == k_lo or k_lo + 1) is derived from the k_lo one with a
    single extra count + masked-min pass instead of a second bisection.
    """
    Ei = pltpu.bitcast(E, jnp.int32)
    # Per-row max (f32 lane reduce, then bitcast the tiny (S,TR,1) result).
    hi0 = pltpu.bitcast(jnp.max(E, axis=-1, keepdims=True), jnp.int32)
    lo0 = jnp.full_like(hi0, -1)            # count(x <= -1) == 0 <= k_lo
    kp1 = float(k_lo + 1)

    def body(_, carry):
        lo, hi = carry
        mid = lo + jnp.right_shift(hi - lo, 1)      # no int32 overflow
        cnt = jnp.sum((Ei <= mid).astype(jnp.float32), axis=-1, keepdims=True)
        go_left = cnt >= kp1                        # k_lo-th smallest lies in (lo, mid]
        return jnp.where(go_left, lo, mid), jnp.where(go_left, mid, hi)

    # Width(lo,hi) <= 2^31 for any finite non-negative f32 data, so 31
    # ceil-halving steps always reach width 1; `hi` is then the exact answer.
    _, hi = lax.fori_loop(0, n_iter, body, (lo0, hi0))
    q_lo = pltpu.bitcast(hi, jnp.float32)
    if k_hi == k_lo:
        return q_lo, q_lo

    # k_hi == k_lo + 1: tie check + smallest element strictly above q_lo.
    cnt_le = jnp.sum((E <= q_lo).astype(jnp.float32), axis=-1, keepdims=True)
    nxt = jnp.min(jnp.where(E > q_lo, E, jnp.inf), axis=-1, keepdims=True)
    q_hi = jnp.where(cnt_le >= float(k_hi + 1), q_lo, nxt)
    return q_lo, q_hi


def _make_kernel(*, inv_tau, k_lo, k_hi, frac, train, scale, num_rows,
                 tile_rows, precision):
    def kernel(colsT_ref, rows_ref, keep_ref, pos_ref, out_ref):
        r = pl.program_id(0)
        # Pre-normalized, pre-transposed operands (hoisted to the wrapper): the
        # resident colsT block is consumed as-is every step.
        rows = rows_ref[...]                             # (S, TR, D)
        colsT = colsT_ref[...]                           # (S, D, Bp)
        keep = keep_ref[...].astype(jnp.float32)         # (TR, Bp) 1=keep, 0=masked/pad
        posoh = pos_ref[...].astype(jnp.float32)         # (TR, Bp) partner one-hot

        # Only the 2P gathered pair rows of each cosine matrix are needed:
        # (S,TR,D) x (S,D,Bp) -> (S,TR,Bp), RHS contracting dim second-to-last
        # (MXU-native layout, no in-kernel transpose), precision pinned.
        sim = jnp.einsum("srd,sdb->srb", rows, colsT,
                         preferred_element_type=jnp.float32,
                         precision=precision)
        exp_sim = jnp.exp(sim * inv_tau)                 # 1/tau folded into a multiply
        exp_masked = exp_sim * keep[None]                # masked_fill(mask, 0)

        # exp_sim[i, j] / exp_sim[j, i] via one-hot weighted row-sum.
        pos = jnp.sum(exp_sim * posoh[None], axis=-1, keepdims=True)   # (S, TR, 1)
        pos = jnp.maximum(pos, 1e-30)                    # pad rows: posoh == 0

        if train:
            q_lo, q_hi = _fused_order_stats(exp_masked, k_lo, k_hi)
            thr = q_lo + frac * (q_hi - q_lo) if k_hi != k_lo else q_lo
            s = jnp.sum(jnp.where(exp_masked >= thr, exp_masked, 0.0),
                        axis=-1, keepdims=True)
        else:
            s = jnp.sum(exp_masked, axis=-1, keepdims=True)

        # Row validity from the row index (no per-step lane reduce over posoh).
        row_ids = lax.broadcasted_iota(jnp.int32, (tile_rows, 1), 0) + r * tile_rows
        valid = (row_ids < num_rows).astype(jnp.float32)           # (TR, 1)

        # -log(pos / (pos + s)) == log(pos + s) - log(pos): EUP logs, no divides.
        loss_rows = (jnp.log(pos + s) - jnp.log(pos)) * valid[None]
        out_ref[...] = jnp.zeros((1, 1), jnp.float32) + jnp.sum(loss_rows) * scale

    return kernel


def _select_tiling(S, D, Bp, R, mask_itemsize, mm_itemsize):
    """Pick the row-tile size and VMEM-limit hint from the device's actual VMEM
    capacity (64 MiB v7x / 128 MiB v5e-v6e) with headroom for Mosaic internal
    scratch, shrinking the tile until the estimated footprint fits."""
    mib = 1024 * 1024
    try:
        capacity = int(pltpu.get_tpu_info().vmem_capacity_bytes)
    except Exception:           # interpret mode / older jax: assume smallest part
        capacity = 64 * mib
    cap = min(capacity - 12 * mib, (capacity * 4) // 5)   # ~51 MiB v7x, ~102 MiB v6e

    def footprint(tr):
        resident = 2 * S * D * Bp * mm_itemsize                      # colsT (dbl-buffered)
        streams = 2 * (S * tr * D * mm_itemsize + 2 * tr * Bp * mask_itemsize)
        temps = 8 * S * tr * Bp * 4                                  # sim/exp/bitcast/cmp
        return resident + streams + temps

    r16 = max(_round_up(R, 16), 16)
    tile = 16
    for cand in (256, 128, 64, 32, 16):
        if cand <= r16 and footprint(cand) <= cap:
            tile = cand
            break
    # TODO(synk): if even footprint(16) > cap (very large B*D on v7x), add a D
    #             (contraction) grid axis with a (TR,Bp) f32 accumulator and
    #             single-buffer the resident colsT block (pipeline_mode=pl.Buffered(1)).
    vmem_limit = int(min(cap, max(32 * mib, 2 * footprint(tile))))
    return tile, vmem_limit


def hard_contrastive_loss_v4(embeddings, positive_pairs, stage="train",
                             tau=0.2, alpha=0.8, gamma=2.0, key=None,
                             dim_mixing=False, normalize=False,
                             matmul_dtype=jnp.float32):
    """JAX/Pallas equivalent of HardContrastiveLossV4.forward."""
    if dim_mixing or normalize:
        # TODO(synk): dim_mixing=True (per-dim lambda) and normalize=True branches
        #             of extrapolate_positive_pairs are not exercised by defaults.
        raise NotImplementedError("dim_mixing / normalize branches not implemented")

    embeddings = embeddings.astype(jnp.float32)
    B, D = embeddings.shape
    P = int(positive_pairs.shape[0])
    ii = positive_pairs[:, 0]
    jj = positive_pairs[:, 1]
    train = stage in ("train", "sanity_check")

    # --- extrapolate_positive_pairs (glue, plain JAX) -------------------------
    if key is None:
        key = jax.random.PRNGKey(42)
    lam = jax.random.beta(key, gamma, gamma).astype(jnp.float32) + 1.0
    emb_i = embeddings[ii]
    emb_j = embeddings[jj]
    hard = (jnp.zeros_like(embeddings)
            .at[ii].set(lam * emb_i + (1.0 - lam) * emb_j)
            .at[jj].set(lam * emb_j + (1.0 - lam) * emb_i))

    # --- hoisted preprocessing: L2-normalize once, gather pair rows from the
    #     normalized matrices, transpose cols to MXU-native (S, D, B) ----------
    rows_idx = jnp.concatenate([ii, jj])                              # (2P,)
    emb_n = _l2_normalize(embeddings)
    if train:
        hard_n = _l2_normalize(hard)
        cols_n = jnp.stack([emb_n, hard_n])                           # (2, B, D)
    else:
        cols_n = emb_n[None]                                          # (1, B, D)
    rows_n = cols_n[:, rows_idx, :]                                   # (S, 2P, D)
    S = cols_n.shape[0]

    # --- mask / one-hot plumbing as narrow bf16 streams -----------------------
    mask_full = (jnp.eye(B, dtype=jnp.float32)
                 .at[ii, jj].set(1.0).at[jj, ii].set(1.0))            # handles repeats
    keep = (1.0 - mask_full[rows_idx]).astype(_MASK_DTYPE)            # (2P, B)
    posoh = jnp.concatenate([jax.nn.one_hot(jj, B, dtype=_MASK_DTYPE),
                             jax.nn.one_hot(ii, B, dtype=_MASK_DTYPE)])  # (2P, B)

    # --- lane-dense padding of the column axis to a multiple of 128 -----------
    # Appended columns are zero embeddings with keep=0 / posoh=0; they sort at
    # the bottom of every row, so the quantile order-stat index just shifts by
    # the number of appended zeros.
    Bp = _round_up(B, 128)
    b_pad = Bp - B
    colsT = jnp.swapaxes(cols_n, 1, 2).astype(matmul_dtype)           # (S, D, B)
    if b_pad:
        colsT = jnp.pad(colsT, ((0, 0), (0, 0), (0, b_pad)))
        keep = jnp.pad(keep, ((0, 0), (0, b_pad)))
        posoh = jnp.pad(posoh, ((0, 0), (0, b_pad)))
    rows = rows_n.astype(matmul_dtype)

    # --- adaptive row-tile / VMEM budget, row padding --------------------------
    R = 2 * P
    mm_itemsize = jnp.dtype(matmul_dtype).itemsize
    TR, vmem_limit = _select_tiling(S, D, Bp, R,
                                    jnp.dtype(_MASK_DTYPE).itemsize, mm_itemsize)
    R_pad = _round_up(R, TR)
    pad = R_pad - R
    if pad:
        rows = jnp.pad(rows, ((0, 0), (0, pad), (0, 0)))   # zero rows -> masked out
        keep = jnp.pad(keep, ((0, pad), (0, 0)))
        posoh = jnp.pad(posoh, ((0, pad), (0, 0)))

    # torch.quantile(alpha, interpolation='linear') order-stat indices, shifted
    # by the number of appended zero columns.
    idx = alpha * (B - 1)
    k_lo = int(math.floor(idx)) + b_pad
    k_hi = int(math.ceil(idx)) + b_pad
    frac = float(idx - math.floor(idx))

    precision = (lax.Precision.HIGHEST
                 if jnp.dtype(matmul_dtype) == jnp.dtype(jnp.float32)
                 else lax.Precision.DEFAULT)

    kernel = _make_kernel(inv_tau=1.0 / tau, k_lo=k_lo, k_hi=k_hi, frac=frac,
                          train=train, scale=1.0 / (2.0 * P * S), num_rows=R,
                          tile_rows=TR, precision=precision)

    num_tiles = R_pad // TR
    partials = pl.pallas_call(
        kernel,
        out_shape=jax.ShapeDtypeStruct((num_tiles, 1), jnp.float32),
        grid=(num_tiles,),
        in_specs=[
            pl.BlockSpec((S, D, Bp), lambda r: (0, 0, 0)),   # resident, preprocessed
            pl.BlockSpec((S, TR, D), lambda r: (0, r, 0)),   # pipelined row tiles
            pl.BlockSpec((TR, Bp), lambda r: (r, 0)),        # keep (bf16)
            pl.BlockSpec((TR, Bp), lambda r: (r, 0)),        # partner one-hot (bf16)
        ],
        out_specs=pl.BlockSpec((1, 1), lambda r: (r, 0)),    # per-tile partial sum
        compiler_params=pltpu.CompilerParams(
            dimension_semantics=("parallel",),               # both TCs on v7x
            vmem_limit_bytes=vmem_limit),
    )(colsT, rows, keep, posoh)
    return jnp.sum(partials)


def reference_loss(embeddings, positive_pairs, stage, tau, alpha, gamma, key):
    """Pure-JAX reference mirroring HardContrastiveLossV4.forward (validation)."""
    B = embeddings.shape[0]
    ii = positive_pairs[:, 0]
    jj = positive_pairs[:, 1]
    lam = jax.random.beta(key, gamma, gamma).astype(jnp.float32) + 1.0
    hard = (jnp.zeros_like(embeddings)
            .at[ii].set(lam * embeddings[ii] + (1.0 - lam) * embeddings[jj])
            .at[jj].set(lam * embeddings[jj] + (1.0 - lam) * embeddings[ii]))

    def cos_mat(x):
        n2 = jnp.sum(x * x, axis=1, keepdims=True)
        xn = x * lax.rsqrt(jnp.maximum(n2, 1e-16))
        return jnp.matmul(xn, xn.T, precision=lax.Precision.HIGHEST)

    def calc_loss(sim):
        mask = jnp.eye(B, dtype=bool).at[ii, jj].set(True).at[jj, ii].set(True)
        exp_sim = jnp.exp(sim / tau)
        exp_m = jnp.where(mask, 0.0, exp_sim)
        pos_ij = exp_sim[ii, jj]
        pos_ji = exp_sim[jj, ii]
        Ei = exp_m[ii]
        Ej = exp_m[jj]
        if stage in ("train", "sanity_check"):
            ti = jnp.quantile(Ei, alpha, axis=1, keepdims=True)
            tj = jnp.quantile(Ej, alpha, axis=1, keepdims=True)
            si = jnp.sum(jnp.where(Ei >= ti, Ei, 0.0), axis=1)
            sj = jnp.sum(jnp.where(Ej >= tj, Ej, 0.0), axis=1)
        else:
            si = Ei.sum(1)
            sj = Ej.sum(1)
        l = (-jnp.log(pos_ij / (pos_ij + si)) - jnp.log(pos_ji / (pos_ji + sj))).sum()
        return l / (2.0 * ii.shape[0])

    loss_o = calc_loss(cos_mat(embeddings))
    if stage in ("train", "sanity_check"):
        loss_h = calc_loss(cos_mat(hard))
        return 0.5 * (loss_o + loss_h)
    return loss_o


if __name__ == "__main__":
    key = jax.random.PRNGKey(0)
    k_emb, k_beta = jax.random.split(key)

    B, D = 8, 32
    embeddings = jax.random.normal(k_emb, (B, D), dtype=jnp.float32)
    positive_pairs = jnp.array([[0, 1], [2, 3], [4, 5], [6, 7]], dtype=jnp.int32)

    # train path (quantile-selected negatives, original + hard losses averaged)
    loss = hard_contrastive_loss_v4(embeddings, positive_pairs, stage="train",
                                    tau=0.2, alpha=0.8, gamma=2.0, key=k_beta)
    loss = jax.block_until_ready(loss)
    ref = jax.block_until_ready(
        reference_loss(embeddings, positive_pairs, "train", 0.2, 0.8, 2.0, k_beta))
    np.testing.assert_allclose(np.asarray(loss), np.asarray(ref),
                               rtol=1e-3, atol=1e-3)

    # eval path (all negatives, original loss only)
    loss_v = hard_contrastive_loss_v4(embeddings, positive_pairs, stage="val",
                                      tau=0.2, alpha=0.8, gamma=2.0, key=k_beta)
    loss_v = jax.block_until_ready(loss_v)
    ref_v = jax.block_until_ready(
        reference_loss(embeddings, positive_pairs, "val", 0.2, 0.8, 2.0, k_beta))
    np.testing.assert_allclose(np.asarray(loss_v), np.asarray(ref_v),
                               rtol=1e-3, atol=1e-3)

    print("KERNEL_OK")
</pallas_src>

<mosaic_0001>
module attributes {stable_mosaic.version = 11 : i64} {
  func.func @kernel(%arg0: i32, %arg1: memref<2x32x128xf32, #tpu.memory_space<vmem>>, %arg2: memref<2x16x32xf32, #tpu.memory_space<vmem>>, %arg3: memref<16x128xbf16, #tpu.memory_space<vmem>>, %arg4: memref<16x128xbf16, #tpu.memory_space<vmem>>, %arg5: memref<1x1xf32, #tpu.memory_space<vmem>>) attributes {dimension_semantics = [#tpu.dimension_semantics<parallel>], iteration_bounds = array<i64: 1>, scalar_prefetch = 0 : i64, scratch_operands = 0 : i64, tpu.core_type = #tpu.core_type<tc>, window_params = [{pipeline_mode = #tpu.pipeline_mode<synchronous>, transform_indices = @transform_0, window_bounds = array<i64: 2, 32, 128>}, {transform_indices = @transform_1, window_bounds = array<i64: 2, 16, 32>}, {transform_indices = @transform_2, window_bounds = array<i64: 16, 128>}, {transform_indices = @transform_3, window_bounds = array<i64: 16, 128>}, {transform_indices = @transform_4, window_bounds = array<i64: 1, 1>}]} {
    %c0 = arith.constant 0 : index
    %c0_0 = arith.constant 0 : index
    %c0_1 = arith.constant 0 : index
    %0 = vector.load %arg2[%c0, %c0_0, %c0_1] : memref<2x16x32xf32, #tpu.memory_space<vmem>>, vector<2x16x32xf32>
    %c0_2 = arith.constant 0 : index
    %c0_3 = arith.constant 0 : index
    %c0_4 = arith.constant 0 : index
    %1 = vector.load %arg1[%c0_2, %c0_3, %c0_4] : memref<2x32x128xf32, #tpu.memory_space<vmem>>, vector<2x32x128xf32>
    %c0_5 = arith.constant 0 : index
    %c0_6 = arith.constant 0 : index
    %2 = vector.load %arg3[%c0_5, %c0_6] : memref<16x128xbf16, #tpu.memory_space<vmem>>, vector<16x128xbf16>
    %3 = arith.extf %2 : vector<16x128xbf16> to vector<16x128xf32>
    %c0_7 = arith.constant 0 : index
    %c0_8 = arith.constant 0 : index
    %4 = vector.load %arg4[%c0_7, %c0_8] : memref<16x128xbf16, #tpu.memory_space<vmem>>, vector<16x128xbf16>
    %5 = arith.extf %4 : vector<16x128xbf16> to vector<16x128xf32>
    "tpu.trace_start"() <{level = 10 : i32, message = "srd,sdb->srb"}> : () -> ()
    %cst = arith.constant dense<0.000000e+00> : vector<2x16x128xf32>
    %6 = tpu.matmul %0, %1, %cst {dimension_numbers = #tpu.dot_dimension_numbers<[2], [1], [1], [2], [0, 0, 0, 1, 1, 2], [0], [0]>, precision = #tpu.contract_precision<fp32>} : vector<2x16x32xf32>, vector<2x32x128xf32>, vector<2x16x128xf32> -> vector<2x16x128xf32>
    "tpu.trace_stop"() : () -> ()
    %cst_9 = arith.constant 5.000000e+00 : f32
    %7 = vector.broadcast %cst_9 : f32 to vector<2x16x128xf32>
    %8 = arith.mulf %6, %7 : vector<2x16x128xf32>
    %9 = math.exp %8 : vector<2x16x128xf32>
    %10 = vector.shape_cast %3 : vector<16x128xf32> to vector<1x16x128xf32>
    %11 = vector.broadcast %10 : vector<1x16x128xf32> to vector<2x16x128xf32>
    %12 = arith.mulf %9, %11 : vector<2x16x128xf32>
    %13 = vector.shape_cast %5 : vector<16x128xf32> to vector<1x16x128xf32>
    %14 = vector.broadcast %13 : vector<1x16x128xf32> to vector<2x16x128xf32>
    %15 = arith.mulf %9, %14 : vector<2x16x128xf32>
    %cst_10 = arith.constant dense<0.000000e+00> : vector<2x16xf32>
    %16 = vector.multi_reduction <add>, %15, %cst_10 [2] : vector<2x16x128xf32> to vector<2x16xf32>
    %17 = vector.shape_cast %16 : vector<2x16xf32> to vector<2x16x1xf32>
    %cst_11 = arith.constant 1.000000e-30 : f32
    %18 = vector.broadcast %cst_11 : f32 to vector<2x16x1xf32>
    %19 = arith.maximumf %17, %18 : vector<2x16x1xf32>
    %20 = tpu.bitcast %12 : vector<2x16x128xf32> -> vector<2x16x128xi32>
    %cst_12 = arith.constant dense<0xFF800000> : vector<2x16xf32>
    %21 = vector.multi_reduction <maximumf>, %12, %cst_12 [2] : vector<2x16x128xf32> to vector<2x16xf32>
    %22 = vector.shape_cast %21 : vector<2x16xf32> to vector<2x16x1xf32>
    %23 = tpu.bitcast %22 : vector<2x16x1xf32> -> vector<2x16x1xi32>
    %c-1_i32 = arith.constant -1 : i32
    %24 = vector.broadcast %c-1_i32 : i32 to vector<2x16x1xi32>
    %c0_i32 = arith.constant 0 : i32
    %c31_i32 = arith.constant 31 : i32
    %25 = arith.addi %c0_i32, %c31_i32 : i32
    %c1_i32 = arith.constant 1 : i32
    %26:2 = scf.for %arg6 = %c0_i32 to %25 step %c1_i32 iter_args(%arg7 = %24, %arg8 = %23) -> (vector<2x16x1xi32>, vector<2x16x1xi32>)  : i32 {
      %77 = arith.subi %arg8, %arg7 : vector<2x16x1xi32>
      %c1_i32_25 = arith.constant 1 : i32
      %78 = vector.broadcast %c1_i32_25 : i32 to vector<2x16x1xi32>
      %79 = arith.shrsi %77, %78 : vector<2x16x1xi32>
      %80 = arith.addi %arg7, %79 : vector<2x16x1xi32>
      %81 = vector.broadcast %80 : vector<2x16x1xi32> to vector<2x16x128xi32>
      %82 = arith.cmpi sle, %20, %81 : vector<2x16x128xi32>
      %83 = arith.extui %82 : vector<2x16x128xi1> to vector<2x16x128xi32>
      %84 = arith.sitofp %83 : vector<2x16x128xi32> to vector<2x16x128xf32>
      %cst_26 = arith.constant dense<0.000000e+00> : vector<2x16xf32>
      %85 = vector.multi_reduction <add>, %84, %cst_26 [2] : vector<2x16x128xf32> to vector<2x16xf32>
      %86 = vector.shape_cast %85 : vector<2x16xf32> to vector<2x16x1xf32>
      %cst_27 = arith.constant 1.260000e+02 : f32
      %87 = vector.broadcast %cst_27 : f32 to vector<2x16x1xf32>
      %88 = arith.cmpf oge, %86, %87 : vector<2x16x1xf32>
      %89 = arith.select %88, %arg7, %80 : vector<2x16x1xi1>, vector<2x16x1xi32>
      %90 = arith.select %88, %80, %arg8 : vector<2x16x1xi1>, vector<2x16x1xi32>
      scf.yield %89, %90 : vector<2x16x1xi32>, vector<2x16x1xi32>
    }
    %27 = tpu.bitcast %26#1 : vector<2x16x1xi32> -> vector<2x16x1xf32>
    %28 = vector.broadcast %27 : vector<2x16x1xf32> to vector<2x16x128xf32>
    %29 = arith.cmpf ole, %12, %28 : vector<2x16x128xf32>
    %30 = arith.extui %29 : vector<2x16x128xi1> to vector<2x16x128xi32>
    %31 = arith.sitofp %30 : vector<2x16x128xi32> to vector<2x16x128xf32>
    %cst_13 = arith.constant dense<0.000000e+00> : vector<2x16xf32>
    %32 = vector.multi_reduction <add>, %31, %cst_13 [2] : vector<2x16x128xf32> to vector<2x16xf32>
    %33 = vector.shape_cast %32 : vector<2x16xf32> to vector<2x16x1xf32>
    %34 = vector.broadcast %27 : vector<2x16x1xf32> to vector<2x16x128xf32>
    %35 = arith.cmpf ogt, %12, %34 : vector<2x16x128xf32>
    %cst_14 = arith.constant 0x7F800000 : f32
    %36 = vector.broadcast %cst_14 : f32 to vector<2x16x128xf32>
    %37 = arith.select %35, %12, %36 : vector<2x16x128xi1>, vector<2x16x128xf32>
    %cst_15 = arith.constant dense<0x7F800000> : vector<2x16xf32>
    %38 = vector.multi_reduction <minimumf>, %37, %cst_15 [2] : vector<2x16x128xf32> to vector<2x16xf32>
    %39 = vector.shape_cast %38 : vector<2x16xf32> to vector<2x16x1xf32>
    %cst_16 = arith.constant 1.270000e+02 : f32
    %40 = vector.broadcast %cst_16 : f32 to vector<2x16x1xf32>
    %41 = arith.cmpf oge, %33, %40 : vector<2x16x1xf32>
    %42 = arith.select %41, %27, %39 : vector<2x16x1xi1>, vector<2x16x1xf32>
    %43 = arith.subf %42, %27 : vector<2x16x1xf32>
    %cst_17 = arith.constant 6.000000e-01 : f32
    %44 = vector.broadcast %cst_17 : f32 to vector<2x16x1xf32>
    %45 = arith.mulf %44, %43 : vector<2x16x1xf32>
    %46 = arith.addf %27, %45 : vector<2x16x1xf32>
    %47 = vector.broadcast %46 : vector<2x16x1xf32> to vector<2x16x128xf32>
    %48 = arith.cmpf oge, %12, %47 : vector<2x16x128xf32>
    %cst_18 = arith.constant 0.000000e+00 : f32
    %49 = vector.broadcast %cst_18 : f32 to vector<2x16x128xf32>
    %50 = arith.select %48, %12, %49 : vector<2x16x128xi1>, vector<2x16x128xf32>
    %cst_19 = arith.constant dense<0.000000e+00> : vector<2x16xf32>
    %51 = vector.multi_reduction <add>, %50, %cst_19 [2] : vector<2x16x128xf32> to vector<2x16xf32>
    %52 = vector.shape_cast %51 : vector<2x16xf32> to vector<2x16x1xf32>
    %53 = tpu.iota {dimensions = array<i32: 0>} : vector<16x1xi32>
    %c16_i32 = arith.constant 16 : i32
    %54 = arith.muli %arg0, %c16_i32 : i32
    %55 = vector.broadcast %54 : i32 to vector<16x1xi32>
    %56 = arith.addi %53, %55 : vector<16x1xi32>
    %c8_i32 = arith.constant 8 : i32
    %57 = vector.broadcast %c8_i32 : i32 to vector<16x1xi32>
    %58 = arith.cmpi slt, %56, %57 : vector<16x1xi32>
    %59 = arith.extui %58 : vector<16x1xi1> to vector<16x1xi32>
    %60 = arith.sitofp %59 : vector<16x1xi32> to vector<16x1xf32>
    %61 = arith.addf %19, %52 : vector<2x16x1xf32>
    %62 = math.log %61 : vector<2x16x1xf32>
    %63 = math.log %19 : vector<2x16x1xf32>
    %64 = arith.subf %62, %63 : vector<2x16x1xf32>
    %65 = vector.shape_cast %60 : vector<16x1xf32> to vector<1x16x1xf32>
    %66 = vector.broadcast %65 : vector<1x16x1xf32> to vector<2x16x1xf32>
    %67 = arith.mulf %64, %66 : vector<2x16x1xf32>
    %cst_20 = arith.constant 0.000000e+00 : f32
    %68 = vector.broadcast %cst_20 : f32 to vector<1x1xf32>
    %69 = vector.shape_cast %67 : vector<2x16x1xf32> to vector<1x2x16x1xf32>
    %cst_21 = arith.constant dense<0.000000e+00> : vector<1xf32>
    %70 = vector.multi_reduction <add>, %69, %cst_21 [1, 2, 3] : vector<1x2x16x1xf32> to vector<1xf32>
    %71 = vector.shape_cast %70 : vector<1xf32> to vector<1x1x1x1xf32>
    %72 = vector.extract %71[0, 0, 0, 0] : f32 from vector<1x1x1x1xf32>
    %cst_22 = arith.constant 6.250000e-02 : f32
    %73 = arith.mulf %72, %cst_22 : f32
    %74 = vector.broadcast %73 : f32 to vector<1x1xf32>
    %75 = arith.addf %68, %74 : vector<1x1xf32>
    %c0_23 = arith.constant 0 : index
    %c0_24 = arith.constant 0 : index
    %76 = vector.load %arg5[%c0_23, %c0_24] : memref<1x1xf32, #tpu.memory_space<vmem>>, vector<1x1xf32>
    tpu.vector_store %arg5[%c0_23, %c0_24], %75 {strides = array<i32>} : memref<1x1xf32, #tpu.memory_space<vmem>>, vector<1x1xf32>,
    return
  }
  func.func @transform_0(%arg0: i32) -> (i32, i32, i32) {
    %c0_i32 = arith.constant 0 : i32
    %c0_i32_0 = arith.constant 0 : i32
    %c0_i32_1 = arith.constant 0 : i32
    %c0_i32_2 = arith.constant 0 : i32
    return %c0_i32, %c0_i32_0, %c0_i32_1 : i32, i32, i32
  }
  func.func @transform_1(%arg0: i32) -> (i32, i32, i32) {
    %c0_i32 = arith.constant 0 : i32
    %c0_i32_0 = arith.constant 0 : i32
    %c0_i32_1 = arith.constant 0 : i32
    return %c0_i32, %arg0, %c0_i32_0 : i32, i32, i32
  }
  func.func @transform_2(%arg0: i32) -> (i32, i32) {
    %c0_i32 = arith.constant 0 : i32
    %c0_i32_0 = arith.constant 0 : i32
    return %arg0, %c0_i32 : i32, i32
  }
  func.func @transform_3(%arg0: i32) -> (i32, i32) {
    %c0_i32 = arith.constant 0 : i32
    %c0_i32_0 = arith.constant 0 : i32
    return %arg0, %c0_i32 : i32, i32
  }
  func.func @transform_4(%arg0: i32) -> (i32, i32) {
    %c0_i32 = arith.constant 0 : i32
    %c0_i32_0 = arith.constant 0 : i32
    return %arg0, %c0_i32 : i32, i32
  }
}

</mosaic_0001>

<bundles_post_ra>
// kernel: tpu_custom_call.1
= control target key start
LH: loop header
LB: loop body
LE: loop exit
PB: predicated region body
PF: predicated region fallthrough
CT: control target
= control target key end

     0   :  { %9 = vsyncpa [#allocation3], 0  ;;  %s1463_s0 = inlined_call_operand.hbm [shape: f32[2,32,128], index: 0, kind: input, shape index: {}]   ;;  %s1464_s1 = inlined_call_operand.hbm [shape: f32[2,16,32], index: 1, kind: input, shape index: {}]   ;;  %s1465_s2 = inlined_call_operand.hbm [shape: bf16[16,128], index: 2, kind: input, shape index: {}]   ;;  %s1466_s3 = inlined_call_operand.hbm [shape: bf16[16,128], index: 3, kind: input, shape index: {}]   ;;  %s1467_s4 = inlined_call_operand.hbm [shape: f32[1,1], index: 4, kind: output, shape index: {}]  }
   0x1   :  { %10 = vsyncpa [#allocation6], 0 }
   0x2   :  { %11 = vsyncpa [#allocation9], 0 }
   0x3   :  { %12 = vsyncpa [#allocation4], 0  ;;  %s30_s17 = sshll.u32 %s1464_s1, 4  ;;  %s1164_s18 = smov [#allocation5]   ;;  %s31_s17 = int_to_ptr.hbm [resolvable:$true] %s30_s17 }
   0x4   :  { %s32_s19 = sshll.u32 %s1164_s18, 4  ;;  %s17_s22 = sshll.u32 %s1463_s0, 4  ;;  %s33_s19 = int_to_ptr.vmem [resolvable:$true] %s32_s19  ;;  %s18_s22 = int_to_ptr.hbm [resolvable:$true] %s17_s22 }
   0x5   :  { %s1165_s23 = smov 128   ;;  %s1166_s24 = smov 8  }
   0x6   :  { %38 = dma.hbm_to_vmem [thread:$0]  %s31_s17, 512, %s33_s19, [#allocation6], %s1165_s23, %s1165_s23, %s1166_s24  }
   0x7   :  { %s1167_s25 = smov [#allocation2]   ;;  %s43_s29 = sshll.u32 %s1465_s2, 4  ;;  %s44_s29 = int_to_ptr.hbm [resolvable:$true] %s43_s29 }
   0x8   :  { %s19_s26 = sshll.u32 %s1167_s25, 4  ;;  %s1168_s1 = smov [#allocation7]   ;;  %s20_s26 = int_to_ptr.vmem [resolvable:$true] %s19_s26 }
   0x9   :  { %25 = dma.hbm_to_vmem [thread:$0]  %s18_s22, 1024, %s20_s26, [#allocation3], %s1165_s23, %s1165_s23, %s1166_s24  }
   0xa   :  { %s45_s30 = sshll.u32 %s1168_s1, 4  ;;  %s56_s0 = sshll.u32 %s1466_s3, 4  ;;  %s46_s30 = int_to_ptr.vmem [resolvable:$true] %s45_s30  ;;  %s57_s0 = int_to_ptr.hbm [resolvable:$true] %s56_s0 }
   0xb   :  { %s1169_s7 = smov 64   ;;  %s1170_s8 = smov 4  }
   0xc   :  { %51 = dma.hbm_to_vmem [thread:$0]  %s44_s29, 128, %s46_s30, [#allocation6], %s1169_s7, %s1169_s7, %s1170_s8  }
   0xd   :  { %s1171_s9 = smov [#allocation8]  }
   0xe   :  { %s58_s10 = sshll.u32 %s1171_s9, 4  ;;  %s59_s10 = int_to_ptr.vmem [resolvable:$true] %s58_s10 }
   0xf   :  { %64 = dma.hbm_to_vmem [thread:$0]  %s57_s0, 128, %s59_s10, [#allocation9], %s1169_s7, %s1169_s7, %s1170_s8  }
  0x10   :  { %1120 = dma.done.wait [#allocation3], 1024  }
  0x11   :  { %1121 = vsyncadd [#allocation3], 4294966272 }
  0x12   :  { %1122 = dma.done.wait [#allocation6], 640  }
  0x13   :  { %1123 = vsyncadd [#allocation6], 4294966656 }
  0x14   :  { %1124 = dma.done.wait [#allocation9], 128  }
  0x15   :  { %1125 = vsyncadd [#allocation9], 4294967168  ;;  %vm101_vm0 = vcmask 261120   ;;  %v88_v0 = vld [vmem:[#allocation2 + $0x18] sm:$0xff]  ;;  %v87_v1 = vld [vmem:[#allocation2 + $0x10] sm:$0xff]  ;;  %s1364_s2 = smov 0  }
  0x16   :  { %v86_v2 = vld [vmem:[#allocation2 + $0x8] sm:$0xff]  ;;  %v1212_v3 = vand.u32 4294901760, %v88_v0  ;;  %v1214_v4 = vand.u32 4294901760, %v87_v1  ;;  %v85_v6 = vld [vmem:[#allocation2] sm:$0xff]  ;;  %v92_v8 = vld [vmem:[#allocation2 + $0x38] sm:$0xff] }
  0x17   :  { %v1216_v5 = vand.u32 4294901760, %v86_v2  ;;  %v81_v7 = vld [vmem:[#allocation5] sm:$0xff]  ;;  %v1218_v9 = vand.u32 4294901760, %v85_v6  ;;  %v1221_v11 = vand.u32 4294901760, %v92_v8  ;;  %v91_v12 = vld [vmem:[#allocation2 + $0x30] sm:$0xff]  ;;  %v82_v13 = vld [vmem:[#allocation5 + $0x8] sm:$0xff] }
  0x18   :  { %v103_v10 = vsel %vm101_vm0, %v81_v7, 0  ;;  %121 = vmatpush.msra.mxu0 %v1212_v3  ;;  %v158_v14 = vsub.f32 %v88_v0, %v1212_v3  ;;  %238 = vmatpush.msra.mxu3 %v1212_v3  ;;  %v1227_v15 = vsub.f32 %v87_v1, %v1214_v4  ;;  %v1240_v20 = vand.u32 4294901760, %v91_v12  ;;  %v90_v38 = vld [vmem:[#allocation2 + $0x28] sm:$0xff]  ;;  %v89_v39 = vld [vmem:[#allocation2 + $0x20] sm:$0xff]  ;;  %v83_v40 = vld [vmem:[#allocation5 + $0x10] sm:$0xff] }
  0x19   :  { %v1230_v16 = vsub.f32 %v86_v2, %v1216_v5  ;;  %v1232_v17 = vand.u32 4294901760, %v103_v10  ;;  %v1235_v18 = vsub.f32 %v85_v6, %v1218_v9  ;;  %v1238_v19 = vsub.f32 %v92_v8, %v1221_v11  ;;  %v84_v48 = vld [vmem:[#allocation5 + $0x18] sm:$0xff] }
  0x1a   :  { %v106_v21 = vsel %vm101_vm0, %v82_v13, 0  ;;  %123 = vmatpush.msra.mxu0 %v1214_v4  ;;  %204 = vmatpush.msra.mxu2 %v158_v14  ;;  %v159_v22 = vand.u32 4294901760, %v158_v14  ;;  %v165_v24 = vand.u32 4294901760, %v1227_v15  ;;  %v1253_v29 = vsub.f32 %v91_v12, %v1240_v20 }
  0x1b   :  { %v129_v23 = vsub.f32 %v103_v10, %v1232_v17  ;;  %v171_v25 = vand.u32 4294901760, %v1230_v16  ;;  %240 = vmatpush.msra.mxu3 %v1214_v4  ;;  %v381_v26 = vand.u32 4294901760, %v1238_v19  ;;  %v177_v27 = vand.u32 4294901760, %v1235_v18 }
  0x1c   :  { %v1250_v28 = vand.u32 4294901760, %v106_v21  ;;  %125 = vmatpush.msra.mxu0 %v1216_v5  ;;  %207 = vmatpush.msra.mxu2 %v1227_v15  ;;  %v160_v30 = vsub.f32 %v158_v14, %v159_v22  ;;  %v166_v32 = vsub.f32 %v1227_v15, %v165_v24  ;;  %v387_v37 = vand.u32 4294901760, %v1253_v29 }
  0x1d   :  { %v130_v31 = vand.u32 4294901760, %v129_v23  ;;  %v172_v33 = vsub.f32 %v1230_v16, %v171_v25  ;;  %242 = vmatpush.msra.mxu3 %v1216_v5  ;;  %v382_v34 = vsub.f32 %v1238_v19, %v381_v26  ;;  %v178_v35 = vsub.f32 %v1235_v18, %v177_v27 }
  0x1e   :  { %v137_v36 = vsub.f32 %v106_v21, %v1250_v28  ;;  %127 = vmatpush.msra.mxu0 %v1218_v9  ;;  %v161_v41 = vand.u32 4294901760, %v160_v30  ;;  %210 = vmatpush.msra.mxu2 %v1230_v16  ;;  %v167_v43 = vand.u32 4294901760, %v166_v32  ;;  %v388_v47 = vsub.f32 %v1253_v29, %v387_v37 }
  0x1f   :  { %v131_v42 = vsub.f32 %v129_v23, %v130_v31  ;;  %244 = vmatpush.msra.mxu3 %v1218_v9  ;;  %v173_v44 = vand.u32 4294901760, %v172_v33  ;;  %v383_v45 = vand.u32 4294901760, %v382_v34  ;;  %v1275_v50 = vand.u32 4294901760, %v90_v38 }
  0x20   :  { %273 = vmatpush.msrb.mxu0 %v159_v22  ;;  %v138_v46 = vand.u32 4294901760, %v137_v36  ;;  %162 = vmatpush.msra.mxu1 %v161_v41  ;;  %v1277_v51 = vand.u32 4294901760, %v89_v39  ;;  %v325_v52 = vsel %vm101_vm0, %v83_v40, 0  ;;  %v179_v53 = vand.u32 4294901760, %v178_v35 }
  0x21   :  { %v132_v49 = vand.u32 4294901760, %v131_v42  ;;  %213 = vmatpush.msra.mxu2 %v1235_v18  ;;  %248 = vmatmul.f32.vlgmr.msra.gmra.mxu3 %v130_v31  ;;  %v389_v54 = vand.u32 4294901760, %v388_v47  ;;  %v1280_v55 = vand.u32 4294901760, %v325_v52  ;;  %v392_v57 = vsub.f32 %v90_v38, %v1275_v50 }
  0x22   :  { %216 = vmatmul.f32.vlgmr.msra.gmra.mxu2 %v129_v23  ;;  %168 = vmatpush.msra.mxu1 %v167_v43  ;;  %v139_v56 = vsub.f32 %v137_v36, %v138_v46  ;;  %v398_v58 = vsub.f32 %v89_v39, %v1277_v51  ;;  %v328_v59 = vsel %vm101_vm0, %v84_v48, 0 }
  0x23   :  { %133 = vmatmul.f32.vlgmr.msra.gmra.mxu0 %v132_v49  ;;  %343 = vmatpush.msrb.mxu2 %v1221_v11  ;;  %v1287_v60 = vsub.f32 %v325_v52, %v1280_v55  ;;  %v393_v61 = vand.u32 4294901760, %v392_v57  ;;  %v358_v0 = vand.u32 4294901760, %v328_v59 }
  0x24   :  { %384 = vmatpush.msrb.mxu3 %v383_v45  ;;  %174 = vmatpush.msra.mxu1 %v173_v44  ;;  %v399_v62 = vand.u32 4294901760, %v398_v58  ;;  %v140_v1 = vand.u32 4294901760, %v139_v56 }
  0x25   :  { %277 = vmatpush.msrb.mxu0 %v165_v24  ;;  %345 = vmatpush.msrb.mxu2 %v1240_v20  ;;  %v352_v63 = vand.u32 4294901760, %v1287_v60  ;;  %v394_v2 = vsub.f32 %v392_v57, %v393_v61  ;;  %v359_v12 = vsub.f32 %v328_v59, %v358_v0 }
  0x26   :  { %390 = vmatpush.msrb.mxu3 %v389_v54  ;;  %180 = vmatpush.msra.mxu1 %v179_v53  ;;  %v400_v6 = vsub.f32 %v398_v58, %v399_v62 }
  0x27   :  { %281 = vmatpush.msrb.mxu0 %v171_v25  ;;  %182 = vmatmul.f32.vlgmr.msra.gmra.mxu1 %v1232_v17  ;;  %v395_v7 = vand.u32 4294901760, %v394_v2  ;;  %v353_v10 = vsub.f32 %v1287_v60, %v352_v63  ;;  %v360_v13 = vand.u32 4294901760, %v359_v12 }
  0x28   :  { %347 = vmatpush.msrb.mxu2 %v1275_v50  ;;  %308 = vmatpush.msrb.mxu1 %v1212_v3  ;;  %v401_v8 = vand.u32 4294901760, %v400_v6 }
  0x29   :  { %285 = vmatpush.msrb.mxu0 %v177_v27  ;;  %254 = vmatmul.f32.gmra.mxu3 %v138_v46  ;;  %v354_v3 = vand.u32 4294901760, %v353_v10 }
  0x2a   :  { %221 = vmatmul.f32.gmra.mxu2 %v137_v36  ;;  %310 = vmatpush.msrb.mxu1 %v1214_v4  ;;  %v361_v4 = vsub.f32 %v359_v12, %v360_v13  ;;  %v852_v36 = vld [vmem:[#allocation8] sm:$0xff]  }
  0x2b   :  { %141 = vmatmul.f32.gmra.mxu0 %v140_v1  ;;  %396 = vmatpush.msrb.mxu3 %v395_v7  ;;  %v853_v42 = vunpack.c.l.bf16 %v852_v36  ;;  %v854_v56 = vunpack.c.h.bf16 %v852_v36 }
  0x2c   :  { %349 = vmatpush.msrb.mxu2 %v1277_v51  ;;  %312 = vmatpush.msrb.mxu1 %v1216_v5  ;;  %v362_v5 = vand.u32 4294901760, %v361_v4 }
  0x2d   :  { %402 = vmatpush.msrb.mxu3 %v401_v8  ;;  %426 = vmatpush.msra.mxu0 %v1238_v19 }
  0x2e   :  { %495 = vmatpush.msra.mxu2 %v381_v26  ;;  %314 = vmatpush.msrb.mxu1 %v1218_v9 }
  0x2f   :  { %530 = vmatpush.msra.mxu3 %v1221_v11  ;;  %186 = vmatmul.f32.gmra.mxu1 %v1250_v28 }
  0x30   :  { %499 = vmatpush.msra.mxu2 %v387_v37  ;;  %460 = vmatpush.msra.mxu1 %v1221_v11  ;;  %v848_v37 = vld [vmem:[#allocation7] sm:$0xff]  }
  0x31   :  { %429 = vmatpush.msra.mxu0 %v1253_v29  ;;  %404 = vmatmul.f32.vlgmr.msrb.gmra.mxu3 %v1280_v55  ;;  %v849_v43 = vunpack.c.l.bf16 %v848_v37 }
  0x32   :  { %355 = vmatmul.f32.vlgmr.msrb.gmra.mxu2 %v354_v3  ;;  %532 = vmatpush.msra.mxu3 %v1240_v20 }
  0x33   :  { %287 = vmatmul.f32.vlgmr.msrb.gmra.mxu0 %v1232_v17  ;;  %462 = vmatpush.msra.mxu1 %v1240_v20 }
  0x34   :  { %503 = vmatpush.msra.mxu2 %v393_v61  ;;  %432 = vmatpush.msra.mxu0 %v392_v57  ;;  %v850_v57 = vunpack.c.h.bf16 %v848_v37 }
  0x35   :  { %534 = vmatpush.msra.mxu3 %v1275_v50  ;;  %464 = vmatpush.msra.mxu1 %v1275_v50 }
  0x36   :  { %507 = vmatpush.msra.mxu2 %v399_v62  ;;  %435 = vmatpush.msra.mxu0 %v398_v58 }
  0x37   :  { %536 = vmatpush.msra.mxu3 %v1277_v51  ;;  %316 = vmatmul.f32.vlgmr.msrb.gmra.mxu1 %v1232_v17 }
  0x38   :  { %466 = vmatpush.msra.mxu1 %v1277_v51 }
  0x39   :  { %408 = vmatmul.f32.gmra.mxu3 %v358_v0 }
  0x3a   :  { %363 = vmatmul.f32.gmra.mxu2 %v362_v5 }
  0x3b   :  { %291 = vmatmul.f32.gmra.mxu0 %v1250_v28 }
  0x3f   :  { %320 = vmatmul.f32.gmra.mxu1 %v1250_v28 }
  0x41   :  { %538 = vmatmul.f32.vlgmr.msra.gmra.mxu3 %v1280_v55 }
  0x42   :  { %509 = vmatmul.f32.vlgmr.msra.gmra.mxu2 %v1280_v55 }
  0x43   :  { %438 = vmatmul.f32.vlgmr.msra.gmra.mxu0 %v1287_v60 }
  0x47   :  { %470 = vmatmul.f32.vlgmr.msra.gmra.mxu1 %v352_v63 }
  0x49   :  { %542 = vmatmul.f32.gmra.mxu3 %v358_v0 }
  0x4a   :  { %513 = vmatmul.f32.gmra.mxu2 %v358_v0 }
  0x4b   :  { %443 = vmatmul.f32.gmra.mxu0 %v359_v12 }
  0x4f   :  { %476 = vmatmul.f32.gmra.mxu1 %v360_v13 }
  0xa0   :  { %v134_v9 = vpop.f32.mrf.mxu0 }
  0xa4   :  { %v183_v11 = vpop.f32.mrf.mxu1  ;;  %v249_v15 = vpop.f32.mrf.mxu3 }
  0xa5   :  { %v217_v14 = vpop.f32.mrf.mxu2  ;;  %v184_v17 = vadd.f32 %v183_v11, %v134_v9 }
  0xa7   :  { %v218_v20 = vadd.f32 %v217_v14, %v184_v17 }
  0xa8   :  { %v142_v16 = vpop.f32.mrf.mxu0 }
  0xa9   :  { %v250_v23 = vadd.f32 %v249_v15, %v218_v20 }
  0xac   :  { %v187_v18 = vpop.f32.mrf.mxu1  ;;  %v255_v21 = vpop.f32.mrf.mxu3 }
  0xad   :  { %v222_v19 = vpop.f32.mrf.mxu2  ;;  %v188_v24 = vadd.f32 %v187_v18, %v142_v16 }
  0xaf   :  { %v223_v28 = vadd.f32 %v222_v19, %v188_v24 }
  0xb0   :  { %v288_v22 = vpop.f32.mrf.mxu0 }
  0xb1   :  { %v289_v25 = vadd.f32 %v288_v22, %v250_v23  ;;  %v256_v33 = vadd.f32 %v255_v21, %v223_v28 }
  0xb4   :  { %v317_v26 = vpop.f32.mrf.mxu1  ;;  %v405_v30 = vpop.f32.mrf.mxu3 }
  0xb5   :  { %v356_v27 = vpop.f32.mrf.mxu2  ;;  %v318_v29 = vadd.f32 %v317_v26, %v289_v25 }
  0xb6   :  { %v406_v47 = vadd.f32 %v405_v30, %v356_v27  ;;  %v1356_v30 = vmov 4294967295  }
  0xb7   :  { %v546_v31 = vmul.f32 5.0, %v318_v29 }
  0xb8   :  { %v292_v32 = vpop.f32.mrf.mxu0 }
  0xb9   :  { %v550_v34 = vmul.f32 1.442695, %v546_v31  ;;  %v293_v35 = vadd.f32 %v292_v32, %v256_v33  ;;  %v1358_v31 = vmov 4294967295   ;;  %v1360_v32 = vmov 4294967295  }
  0xba   :  { %v1362_v33 = vmov 4294967295  }
  0xbb   :  { %940 = vpow2.f32 %v550_v34 }
  0xbc   :  { %v321_v38 = vpop.f32.mrf.mxu1  ;;  %v409_v41 = vpop.f32.mrf.mxu3 }
  0xbd   :  { %v364_v39 = vpop.f32.mrf.mxu2  ;;  %v322_v40 = vadd.f32 %v321_v38, %v293_v35 }
  0xbe   :  { %v410_v61 = vadd.f32 %v409_v41, %v364_v39 }
  0xbf   :  { %v547_v44 = vmul.f32 5.0, %v322_v40 }
  0xc0   :  { %v439_v45 = vpop.f32.mrf.mxu0 }
  0xc1   :  { %v941_v46 = vpop.eup %940  ;;  %v552_v48 = vmul.f32 1.442695, %v547_v44  ;;  %v440_v51 = vadd.f32 %v439_v45, %v406_v47 }
  0xc2   :  { %v562_v49 = vmul.f32 %v941_v46, %v853_v42  ;;  %v1324_v50 = vmul.f32 %v941_v46, %v849_v43 }
  0xc3   :  { %942 = vpow2.f32 %v552_v48 }
  0xc4   :  { %v471_v52 = vpop.f32.mrf.mxu1  ;;  %566 = vadd.xlane.f32.xlu0 %v562_v49  ;;  %582 = vmax.xlane.f32.xlu2 %v1324_v50  ;;  %v539_v55 = vpop.f32.mrf.mxu3 }
  0xc5   :  { %v510_v53 = vpop.f32.mrf.mxu2  ;;  %v472_v54 = vadd.f32 %v471_v52, %v440_v51 }
  0xc7   :  { %v511_v58 = vadd.f32 %v510_v53, %v472_v54 }
  0xc8   :  { %v444_v59 = vpop.f32.mrf.mxu0 }
  0xc9   :  { %v943_v60 = vpop.eup %942  ;;  %v540_v62 = vadd.f32 %v539_v55, %v511_v58  ;;  %v445_v1 = vadd.f32 %v444_v59, %v410_v61 }
  0xca   :  { %v563_v63 = vmul.f32 %v943_v60, %v854_v56  ;;  %v1327_v0 = vmul.f32 %v943_v60, %v850_v57 }
  0xcb   :  { %v548_v2 = vmul.f32 5.0, %v540_v62 }
  0xcc   :  { %v477_v6 = vpop.f32.mrf.mxu1  ;;  %568 = vadd.xlane.f32.xlu0 %v563_v63  ;;  %584 = vmax.xlane.f32.xlu2 %v1327_v0  ;;  %v543_v12 = vpop.f32.mrf.mxu3 }
  0xcd   :  { %v514_v7 = vpop.f32.mrf.mxu2  ;;  %v554_v8 = vmul.f32 1.442695, %v548_v2  ;;  %v478_v10 = vadd.f32 %v477_v6, %v445_v1 }
  0xcf   :  { %944 = vpow2.f32 %v554_v8  ;;  %v515_v3 = vadd.f32 %v514_v7, %v478_v10 }
  0xd1   :  { %v544_v13 = vadd.f32 %v543_v12, %v515_v3 }
  0xd3   :  { %v549_v4 = vmul.f32 5.0, %v544_v13 }
  0xd5   :  { %v945_v5 = vpop.eup %944  ;;  %v556_v9 = vmul.f32 1.442695, %v549_v4 }
  0xd6   :  { %v564_v11 = vmul.f32 %v945_v5, %v853_v42  ;;  %v1330_v14 = vmul.f32 %v945_v5, %v849_v43 }
  0xd7   :  { %946 = vpow2.f32 %v556_v9 }
  0xd8   :  { %570 = vadd.xlane.f32.xlu1 %v564_v11  ;;  %586 = vmax.xlane.f32.xlu0 %v1330_v14 }
  0xdd   :  { %v947_v15 = vpop.eup %946 }
  0xde   :  { %v565_v16 = vmul.f32 %v947_v15, %v854_v56  ;;  %v1333_v17 = vmul.f32 %v947_v15, %v850_v57 }
  0xe0   :  { %572 = vadd.xlane.f32.xlu1 %v565_v16 }
  0xe8   :  { %588 = vmax.xlane.f32.xlu1 %v1333_v17 }
 0x137   :  { %v1336_v18 = vpop.xlane.xlu0 %566  ;;  %v583_v19 = vpop.xlane.xlu2 %582  }
 0x138   :  { %v574_v20 = vmax.f32 %v1336_v18, 1e-30 }
 0x13f   :  { %v1339_v21 = vpop.xlane.xlu0 %568  ;;  %v585_v22 = vpop.xlane.xlu2 %584  }
 0x140   :  { %v575_v23 = vmax.f32 %v1339_v21, 1e-30 }
 0x14b   :  { %v1342_v24 = vpop.xlane.xlu1 %570  ;;  %v587_v25 = vpop.xlane.xlu0 %586  }
 0x14c   :  { %v576_v26 = vmax.f32 %v1342_v24, 1e-30 }
 0x153   :  { %v1345_v27 = vpop.xlane.xlu1 %572 }
 0x154   :  { %v577_v28 = vmax.f32 %v1345_v27, 1e-30 }
 0x15b   :  { %v589_v29 = vpop.xlane.xlu1 %588  }
 0x15c LB: > { %v608_v34 = vsub.s32 %v1142_v19, %v1158_v33  ;;  %v610_v35 = vsub.s32 %v1134_v25, %v1150_v31  ;;  %v609_v37 = vsub.s32 %v1138_v22, %v1154_v32  ;;  %v611_v41 = vsub.s32 %v1130_v29, %v1146_v30  ;;  %s599_s2 = sadd.s32 1, %s1162_s2   ;;  %s1162_s2 = sphi %s1364_s2, %s599_s2   ;;  %v1158_v33 = vphi %v1362_v33, %v644_v33   ;;  %v1154_v32 = vphi %v1360_v32, %v645_v32   ;;  %v1150_v31 = vphi %v1358_v31, %v646_v31   ;;  %v1146_v30 = vphi %v1356_v30, %v647_v30   ;;  %v1142_v19 = vphi %v583_v19, %v1474_v19   ;;  %v1138_v22 = vphi %v585_v22, %v1473_v22   ;;  %v1134_v25 = vphi %v587_v25, %v1472_v25   ;;  %v1130_v29 = vphi %v589_v29, %v1471_v29  }
 0x15d   : > { %v1172_v45 = vmov 0.0   ;;  %p596_p0 = scmp.ge.s32.totalorder %s599_s2, 31  }
 0x15e   : > { %v612_v36 = vshra.s32 %v608_v34, 1  ;;  %v614_v38 = vshra.s32 %v610_v35, 1  ;;  %v613_v40 = vshra.s32 %v609_v37, 1  ;;  %v615_v44 = vshra.s32 %v611_v41, 1  ;;  %s1174_s3 = smov (%p596_p0), [#allocation10]   ;;  %s798_s14 = sshll.u32 (%p596_p0), %s1467_s4, 4  ;;  %s799_s14 = int_to_ptr.hbm [resolvable:$true] %s798_s14 }
 0x15f   :  { %v1173_v60 = vmov (%p596_p0), 0.0   ;;  %948 = vlog2.f32 (%p596_p0), %v575_v23  ;;  %s796_s11 = sshll.u32 (%p596_p0), %s1174_s3, 4  ;;  %s797_s11 = int_to_ptr.vmem [resolvable:$true] %s796_s11 }
 0x160   : > { %v616_v39 = vadd.s32 %v1158_v33, %v612_v36  ;;  %v618_v42 = vadd.s32 %v1150_v31, %v614_v38  ;;  %v617_v43 = vadd.s32 %v1154_v32, %v613_v40  ;;  %v619_v48 = vadd.s32 %v1146_v30, %v615_v44 }
 0x161   :  { %950 = vlog2.f32 (%p596_p0), %v574_v20 }
 0x162   : > { %vm620_vm1 = vcmp.le.s32.totalorder %v1324_v50, %v616_v39  ;;  %vm622_vm2 = vcmp.le.s32.totalorder %v1330_v14, %v618_v42  ;;  %vm621_vm3 = vcmp.le.s32.totalorder %v1327_v0, %v617_v43  ;;  %vm623_vm4 = vcmp.le.s32.totalorder %v1333_v17, %v619_v48 }
 0x163   : > { %v839_v46 = vsel %vm620_vm1, 1.0, %v1172_v45  ;;  %v841_v47 = vsel %vm622_vm2, 1.0, %v1172_v45  ;;  %v840_v49 = vsel %vm621_vm3, 1.0, %v1172_v45  ;;  %v842_v51 = vsel %vm623_vm4, 1.0, %v1172_v45 }
 0x164   : > { %632 = vadd.xlane.f32.xlu0 %v839_v46  ;;  %636 = vadd.xlane.f32.xlu1 %v841_v47 }
 0x16c   : > { %634 = vadd.xlane.f32.xlu0 %v840_v49  ;;  %638 = vadd.xlane.f32.xlu1 %v842_v51 }
 0x1d7   : > { %v633_v52 = vpop.xlane.xlu0 %632  ;;  %v637_v53 = vpop.xlane.xlu1 %636 }
 0x1d8   : > { %vm640_vm5 = vcmp.ge.f32.partialorder %v633_v52, 126.0  ;;  %vm642_vm6 = vcmp.ge.f32.partialorder %v637_v53, 126.0 }
 0x1d9   : > { %v644_v33 = vsel %vm640_vm5, %v1158_v33, %v616_v39   ;;  %v1381_v19 = vsel %vm640_vm5, %v616_v39, %v1142_v19   ;;  %v646_v31 = vsel %vm642_vm6, %v1150_v31, %v618_v42   ;;  %v1383_v25 = vsel %vm642_vm6, %v618_v42, %v1134_v25  }
 0x1da   : > { %v1468_v54 = vmov %v1381_v19  ;;  %v1469_v55 = vmov %v1383_v25 }
 0x1db   : > { %v1472_v25 = vmov %v1469_v55  ;;  %v1474_v19 = vmov %v1468_v54  ;;  %vm656_vm10 = vcmp.le.f32.partialorder (%p596_p0), %v1324_v50, %v1468_v54  ;;  %vm658_vm11 = vcmp.le.f32.partialorder (%p596_p0), %v1330_v14, %v1469_v55 }
 0x1dc   :  { %v843_v62 = vsel (%p596_p0), %vm656_vm10, 1.0, %v1173_v60  ;;  %v845_v63 = vsel (%p596_p0), %vm658_vm11, 1.0, %v1173_v60  ;;  %vm676_vm13 = vcmp.gt.f32.partialorder (%p596_p0), %v1324_v50, %v1468_v54  ;;  %vm678_vm15 = vcmp.gt.f32.partialorder (%p596_p0), %v1330_v14, %v1469_v55 }
 0x1dd   :  { %668 = vadd.xlane.f32.xlu1 (%p596_p0), %v843_v62  ;;  %672 = vadd.xlane.f32.xlu2 (%p596_p0), %v845_v63  ;;  %v680_v2 = vsel (%p596_p0), %vm676_vm13, %v1324_v50, inf  ;;  %v682_v7 = vsel (%p596_p0), %vm678_vm15, %v1330_v14, inf  ;;  %vm789_vm10 = vcmask (%p596_p0), 0  }
 0x1df   : > { %v635_v56 = vpop.xlane.xlu0 %634  ;;  %v639_v57 = vpop.xlane.xlu1 %638  ;;  %598 = sbr.rel (!%p596_p0) target bundleno = 348 (0x15c), region = 59 }
 0x1e0   : > { %vm641_vm7 = vcmp.ge.f32.partialorder %v635_v56, 126.0  ;;  %vm643_vm8 = vcmp.ge.f32.partialorder %v639_v57, 126.0 }
 0x1e1   : > { %v645_v32 = vsel %vm641_vm7, %v1154_v32, %v617_v43   ;;  %v649_v58 = vsel %vm641_vm7, %v617_v43, %v1138_v22   ;;  %v647_v30 = vsel %vm643_vm8, %v1146_v30, %v619_v48   ;;  %v1385_v29 = vsel %vm643_vm8, %v619_v48, %v1130_v29  }
 0x1e2   : > { %v1470_v59 = vmov %v1385_v29  ;;  %v1473_v22 = vmov %v649_v58  ;;  %vm657_vm9 = vcmp.le.f32.partialorder (%p596_p0), %v1327_v0, %v649_v58  ;;  %vm677_vm12 = vcmp.gt.f32.partialorder (%p596_p0), %v1327_v0, %v649_v58 }
 0x1e3   : > { %v1471_v29 = vmov %v1470_v59  ;;  %v844_v61 = vsel (%p596_p0), %vm657_vm9, 1.0, %v1173_v60  ;;  %vm659_vm14 = vcmp.le.f32.partialorder (%p596_p0), %v1333_v17, %v1470_v59  ;;  %v681_v1 = vsel (%p596_p0), %vm677_vm12, %v1327_v0, inf }
 0x1e4   :  { %670 = vadd.xlane.f32.xlu0 %v844_v61  ;;  %v846_v6 = vsel %vm659_vm14, 1.0, %v1173_v60  ;;  %vm679_vm0 = vcmp.gt.f32.partialorder %v1333_v17, %v1470_v59  ;;  %vm769_vm9 = vcmask 7168  }
 0x1e5   :  { %684 = vmin.xlane.f32.xlu1 %v680_v2  ;;  %674 = vadd.xlane.f32.xlu2 %v846_v6  ;;  %v683_v8 = vsel %vm679_vm0, %v1333_v17, inf }
 0x1ec   :  { %686 = vmin.xlane.f32.xlu0 %v681_v1 }
 0x1ed   :  { %690 = vmin.xlane.f32.xlu1 %v683_v8 }
 0x1f4   :  { %688 = vmin.xlane.f32.xlu0 %v682_v7 }
 0x250   :  { %v669_v12 = vpop.xlane.xlu1 %668  ;;  %v673_v3 = vpop.xlane.xlu2 %672 }
 0x251   :  { %vm692_vm2 = vcmp.ge.f32.partialorder %v669_v12, 127.0  ;;  %vm694_vm4 = vcmp.ge.f32.partialorder %v673_v3, 127.0 }
 0x257   :  { %v671_v10 = vpop.xlane.xlu0 %670 }
 0x258   :  { %vm693_vm1 = vcmp.ge.f32.partialorder %v671_v10, 127.0  ;;  %v685_v4 = vpop.xlane.xlu1 %684  ;;  %v675_v16 = vpop.xlane.xlu2 %674 }
 0x259   :  { %v696_v9 = vsel %vm692_vm2, %v1468_v54, %v685_v4  ;;  %vm695_vm3 = vcmp.ge.f32.partialorder %v675_v16, 127.0 }
 0x25a   :  { %v700_v15 = vsub.f32 %v696_v9, %v1468_v54 }
 0x25c   :  { %v704_v22 = vmul.f32 0.6, %v700_v15 }
 0x25e   :  { %v708_v29 = vadd.f32 %v704_v22, %v1468_v54 }
 0x25f   :  { %v687_v13 = vpop.xlane.xlu0 %686 }
 0x260   :  { %v697_v5 = vsel %vm693_vm1, %v649_v58, %v687_v13  ;;  %v691_v31 = vpop.xlane.xlu1 %690  ;;  %vm712_vm6 = vcmp.ge.f32.partialorder %v1324_v50, %v708_v29 }
 0x261   :  { %v701_v11 = vsub.f32 %v697_v5, %v649_v58  ;;  %v699_v33 = vsel %vm695_vm3, %v1470_v59, %v691_v31  ;;  %v716_v35 = vsel %vm712_vm6, %v1324_v50, 0.0 }
 0x262   :  { %v703_v37 = vsub.f32 %v699_v33, %v1470_v59  ;;  %720 = vadd.xlane.f32.xlu0 %v716_v35 }
 0x263   :  { %v705_v19 = vmul.f32 0.6, %v701_v11 }
 0x264   :  { %v707_v39 = vmul.f32 0.6, %v703_v37 }
 0x265   :  { %v709_v25 = vadd.f32 %v705_v19, %v649_v58 }
 0x266   :  { %v711_v41 = vadd.f32 %v707_v39, %v1470_v59 }
 0x267   :  { %v689_v30 = vpop.xlane.xlu0 %688  ;;  %vm713_vm5 = vcmp.ge.f32.partialorder %v1327_v0, %v709_v25 }
 0x268   :  { %v698_v32 = vsel %vm694_vm4, %v1469_v55, %v689_v30  ;;  %v717_v34 = vsel %vm713_vm5, %v1327_v0, 0.0  ;;  %vm715_vm8 = vcmp.ge.f32.partialorder %v1333_v17, %v711_v41 }
 0x269   :  { %v702_v36 = vsub.f32 %v698_v32, %v1469_v55  ;;  %722 = vadd.xlane.f32.xlu2 %v717_v34  ;;  %v719_v50 = vsel %vm715_vm8, %v1333_v17, 0.0 }
 0x26b   :  { %v706_v38 = vmul.f32 0.6, %v702_v36 }
 0x26d   :  { %v710_v40 = vadd.f32 %v706_v38, %v1469_v55 }
 0x26f   :  { %vm714_vm7 = vcmp.ge.f32.partialorder %v1330_v14, %v710_v40 }
 0x270   :  { %v718_v0 = vsel %vm714_vm7, %v1330_v14, 0.0  ;;  %v949_v14 = vpop.eup %948 }
 0x271   :  { %724 = vadd.xlane.f32.xlu1 %v718_v0  ;;  %726 = vadd.xlane.f32.xlu2 %v719_v50  ;;  %v951_v17 = vpop.eup %950  ;;  %v756_v46 = vmul.f32 0.6931472, %v949_v14 }
 0x272   :  { %v754_v53 = vmul.f32 0.6931472, %v951_v17 }
 0x2d5   :  { %v721_v43 = vpop.xlane.xlu0 %720 }
 0x2d6   :  { %v741_v45 = vadd.f32 %v721_v43, %v574_v20 }
 0x2dc   :  { %v723_v42 = vpop.xlane.xlu2 %722 }
 0x2dd   :  { %v742_v44 = vadd.f32 %v723_v42, %v575_v23 }
 0x2df   :  { %952 = vlog2.f32 %v742_v44 }
 0x2e0   :  { %954 = vlog2.f32 %v741_v45 }
 0x2e1   :  { %956 = vlog2.f32 %v577_v28 }
 0x2e2   :  { %958 = vlog2.f32 %v576_v26 }
 0x2e4   :  { %v727_v47 = vpop.xlane.xlu2 %726  ;;  %v725_v21 = vpop.xlane.xlu1 %724 }
 0x2e5   :  { %v953_v23 = vpop.eup %952  ;;  %v744_v48 = vadd.f32 %v727_v47, %v577_v28  ;;  %v743_v18 = vadd.f32 %v725_v21, %v576_v26 }
 0x2e6   :  { %v955_v20 = vpop.eup %954  ;;  %v748_v49 = vmul.f32 0.6931472, %v953_v23 }
 0x2e7   :  { %960 = vlog2.f32 %v744_v48  ;;  %v957_v52 = vpop.eup %956  ;;  %v746_v54 = vmul.f32 0.6931472, %v955_v20 }
 0x2e8   :  { %v762_v51 = vsub.f32 %v748_v49, %v756_v46  ;;  %962 = vlog2.f32 %v743_v18  ;;  %v959_v55 = vpop.eup %958  ;;  %v760_v57 = vmul.f32 0.6931472, %v957_v52 }
 0x2e9   :  { %v761_v59 = vsub.f32 %v746_v54, %v754_v53  ;;  %v758_v60 = vmul.f32 0.6931472, %v959_v55 }
 0x2ea   :  { %v766_v56 = vmul.f32 0.0, %v762_v51 }
 0x2eb   :  { %v770_v63 = vsel %vm769_vm9, %v761_v59, 0.0 }
 0x2ec   :  { %v771_v24 = vsel %vm769_vm9, %v766_v56, 0.0 }
 0x2ed   :  { %v961_v58 = vpop.eup %960  ;;  %v772_v2 = vadd.f32 %v771_v24, %v770_v63 }
 0x2ee   :  { %v963_v61 = vpop.eup %962  ;;  %v752_v27 = vmul.f32 0.6931472, %v961_v58 }
 0x2ef   :  { %v750_v28 = vmul.f32 0.6931472, %v963_v61 }
 0x2f0   :  { %v764_v26 = vsub.f32 %v752_v27, %v760_v57 }
 0x2f1   :  { %v763_v62 = vsub.f32 %v750_v28, %v758_v60 }
 0x2f2   :  { %v768_v1 = vmul.f32 0.0, %v764_v26 }
 0x2f3   :  { %v773_v6 = vsel %vm769_vm9, %v763_v62, 0.0 }
 0x2f4   :  { %v774_v7 = vadd.f32 %v773_v6, %v772_v2  ;;  %v775_v8 = vsel %vm769_vm9, %v768_v1, 0.0 }
 0x2f6   :  { %v776_v10 = vadd.f32 %v775_v8, %v774_v7 }
 0x2f8   :  { %777 = vadd.xlane.f32.xlu0 %v776_v10 }
 0x36b   :  { %v778_v12 = vpop.xlane.xlu0 %777 }
 0x36c   :  { %v779_v3 = vrot.slane %v778_v12, 4 }
 0x36e   :  { %v780_v13 = vadd.f32 %v779_v3, %v778_v12 }
 0x370   :  { %v781_v4 = vrot.slane %v780_v13, 2 }
 0x372   :  { %v782_v5 = vadd.f32 %v781_v4, %v780_v13 }
 0x374   :  { %v783_v9 = vrot.slane %v782_v5, 1 }
 0x376   :  { %v784_v11 = vadd.f32 %v783_v9, %v782_v5 }
 0x378   :  { %855 = vpush %v784_v11 }
 0x3a9   :  { %s856_s15 = spop %855 }
 0x3aa   :  { %s786_s16 = smul.f32 0.0625, %s856_s15 }
 0x3ac   :  { %v787_v15 = vstv %s786_s16 }
 0x3ad   :  { %790 = vst.msk [vmem:[#allocation10] sm:$0x1] %vm789_vm10, %v787_v15 }
 0x3ae   :  { %801 = dma.vmem_to_hbm [thread:$0]  %s797_s11, 16, %s799_s14, [#allocation4]  }
 0x3af   :  { %1126 = dma.done.wait [#allocation4], 16  }
 0x3b0   :  { %1127 = vsyncadd [#allocation4], 4294967280 }
 0x3b1   :  { %806 = vsyncpa [#allocation3], 1 }
 0x3b2   :  { %807 = vsyncpa [#allocation6], 1 }
 0x3b3   :  { %808 = vsyncpa [#allocation9], 1 }
 0x3b4   :  { %809 = vsyncpa [#allocation4], 1 }

</bundles_post_ra>
